<compile_context>
chip_gen: v7x
topology: tpu7x:2x2x1
jax: 0.10.0
libtpu: 0.0.40
codegen_flags: <defaults>
</compile_context>

<pallas_src>
import jax
import jax.numpy as jnp
from jax import lax
from jax.experimental import pallas as pl
from jax.experimental.pallas import tpu as pltpu


def _round_up(x, m):
    return ((x + m - 1) // m) * m


def _hint(x, m):
    # pl.multiple_of only for traced values; pass static ints through untouched.
    return x if isinstance(x, int) else pl.multiple_of(x, m)


def _make_nmse_kernel(*, tr, TB, KB, G, NCS, Rp, needs_mask, accumulate, fold_out):
    """Kernel over a (split, batch-block, row-chunk) grid.

    hest_ref / h_ref : (TB, tr, 128) input tiles (native dtype)
    num_ref / den_ref: (1, TB, 8 or 1, 128) per-batch partial-sum slabs (f32),
                       resident across the row-chunk axis when accumulate.
    """
    NG, REM = divmod(tr, G)      # row groups per batch (REM is a multiple of 8)
    NBG, REMB = divmod(TB, KB)   # batch groups per block

    def kernel(hest_ref, h_ref, num_ref, den_ref):
        # Global row-chunk index: program_id(0) is the optional v7x split axis,
        # program_id(2) the per-split chunk index (reduction axis, last).
        c = pl.program_id(0) * NCS + pl.program_id(2)

        if accumulate:
            @pl.when(pl.program_id(2) == 0)
            def _():
                num_ref[...] = jnp.zeros_like(num_ref)
                den_ref[...] = jnp.zeros_like(den_ref)

        def fold_rows(b0, nb, off, nrows, carry):
            # Load an (nb, nrows, 128) slice (<= 64 rows -> stays in vregs),
            # square / diff it and fold the row axis into (nb, 8, 128) partials
            # with pure VPU vreg adds (layout-preserving reshape, no relayout).
            n_c, d_c = carry
            h = h_ref[pl.ds(b0, nb), pl.ds(off, nrows), :].astype(jnp.float32)
            e = hest_ref[pl.ds(b0, nb), pl.ds(off, nrows), :].astype(jnp.float32)
            diff = h - e
            d2 = diff * diff
            h2 = h * h
            if needs_mask:
                # Zero Pallas-padded (undefined) rows BEFORE folding; keep this
                # ordering if the reduction is ever refactored.
                row = lax.broadcasted_iota(jnp.int32, (nb, nrows, 128), 1)
                valid = (c * tr + off + row) < Rp
                d2 = jnp.where(valid, d2, 0.0)
                h2 = jnp.where(valid, h2, 0.0)
            n_c = n_c + d2.reshape(nb, nrows // 8, 8, 128).sum(axis=1)
            d_c = d_c + h2.reshape(nb, nrows // 8, 8, 128).sum(axis=1)
            return n_c, d_c

        def do_batch_group(b0, nb):
            zero = jnp.zeros((nb, 8, 128), jnp.float32)
            carry = lax.fori_loop(
                0, NG,
                lambda g, cr: fold_rows(b0, nb, _hint(g * G, G), G, cr),
                (zero, zero),
                unroll=True,
            )
            if REM:
                carry = fold_rows(b0, nb, NG * G, REM, carry)
            n_p, d_p = carry
            bsl = pl.ds(b0, nb)
            if fold_out:
                # Small-Rp regime: collapse the 8 sublanes (one XLU reduce per
                # tile) so the per-batch writeback is a single (1,128) row.
                num_ref[0, bsl] = n_p.sum(axis=1, keepdims=True)
                den_ref[0, bsl] = d_p.sum(axis=1, keepdims=True)
            elif accumulate:
                num_ref[0, bsl] += n_p
                den_ref[0, bsl] += d_p
            else:
                num_ref[0, bsl] = n_p
                den_ref[0, bsl] = d_p

        def outer(i, carry):
            do_batch_group(_hint(i * KB, KB), KB)
            return carry

        lax.fori_loop(0, NBG, outer, 0, unroll=True)
        if REMB:
            do_batch_group(NBG * KB, REMB)

    return kernel


def nmse_loss(hest, h, *, block_bytes=1 << 20):
    """NMSE loss: mean_b( sum((H - Hest)^2) / sum(H^2) ), sums over non-batch dims."""
    assert hest.shape == h.shape, "H and Hest must have the same shape"
    B = h.shape[0]
    N = 1
    for d in h.shape[1:]:
        N *= d

    hest_flat = hest.reshape(B, N)
    h_flat = h.reshape(B, N)

    # Tiny feature dims: not worth a kernel launch.
    if N < 1024:
        hf = h_flat.astype(jnp.float32)
        ef = hest_flat.astype(jnp.float32)
        num = jnp.sum((hf - ef) ** 2, axis=1)
        den = jnp.sum(hf ** 2, axis=1)
        return jnp.mean(num / den)

    # Pad the feature dim to a multiple of 8*128 so the (B, Rp, 128) view is a
    # metadata-only reshape and every row block is (8,128)-tileable.  Zero
    # padding contributes 0 to both numerator and denominator, so no wrapper
    # tail pass and no column mask are needed.  NOTE: when N % 1024 != 0 this
    # is ONE explicit HBM copy of each input; when N is aligned (the common
    # case) there is no copy at all.
    Np = _round_up(N, 8 * 128)
    if Np != N:
        pad = Np - N
        hest_flat = jnp.pad(hest_flat, ((0, 0), (0, pad)))
        h_flat = jnp.pad(h_flat, ((0, 0), (0, pad)))
    Rp = Np // 128                         # lane-dense rows per batch (multiple of 8)

    hest3 = hest_flat.reshape(B, Rp, 128)  # metadata-only reshape
    h3 = h_flat.reshape(B, Rp, 128)

    # Size the block by BYTES in the native dtype (~1 MiB per input per block
    # hits ~85% of HBM roofline); f32 -> 2048 rows, bf16 -> 4096, int8 -> 8192.
    itemsize = jnp.dtype(h.dtype).itemsize
    rows_tgt = max(64, (int(block_bytes) // (128 * itemsize)) // 64 * 64)

    if Rp <= rows_tgt:
        # Small feature dim: block several batch elements per grid step so each
        # step still moves ~block_bytes (kills per-grid-step overhead).
        tr = Rp
        TB = max(1, min(B, rows_tgt // Rp))
        NC = 1
    else:
        # Large feature dim: one batch per block, chunk the row axis.
        tr = rows_tgt
        TB = 1
        NC = -(-Rp // tr)
    NB = -(-B // TB)

    # v7x megacore: if there is only one batch block, split the chunk range
    # across a leading size-2 parallel axis so both TensorCores get work.
    SPLIT = 2 if (NB == 1 and NC >= 2) else 1
    NCS = -(-NC // SPLIT)                  # chunks per split
    accumulate = NC > 1
    needs_mask = (SPLIT * NCS * tr) != Rp

    # In-kernel grouping: keep each group's working set <= 64 rows so the f32
    # temporaries never spill to VMEM (protects v5e's single vst slot).
    G = tr if tr < 64 else 64
    KB = 1 if tr >= 64 else max(1, min(TB, 64 // tr))

    # Shrink the per-batch writeback to a (1,128) row when feature dims are
    # small and there is no cross-chunk accumulation.
    fold_out = (not accumulate) and (Rp <= 256)
    out_rows = 1 if fold_out else 8

    kernel = _make_nmse_kernel(tr=tr, TB=TB, KB=KB, G=G, NCS=NCS, Rp=Rp,
                               needs_mask=needs_mask, accumulate=accumulate,
                               fold_out=fold_out)

    if SPLIT == 1:
        in_idx = lambda s, b, j: (b, j, 0)
    else:
        # Clamp so the extra chunk of an uneven split re-reads a valid block;
        # the in-kernel row mask zeroes its contribution.
        in_idx = lambda s, b, j: (b, jnp.minimum(s * NCS + j, NC - 1), 0)
    out_idx = lambda s, b, j: (s, b, 0, 0)

    num_w, den_w = pl.pallas_call(
        kernel,
        out_shape=(
            jax.ShapeDtypeStruct((SPLIT, B, out_rows, 128), jnp.float32),
            jax.ShapeDtypeStruct((SPLIT, B, out_rows, 128), jnp.float32),
        ),
        grid_spec=pltpu.PrefetchScalarGridSpec(
            num_scalar_prefetch=0,
            grid=(SPLIT, NB, NCS),                 # reduction (chunk) axis last
            in_specs=[
                pl.BlockSpec((TB, tr, 128), in_idx),
                pl.BlockSpec((TB, tr, 128), in_idx),
            ],
            out_specs=[
                pl.BlockSpec((1, TB, out_rows, 128), out_idx),
                pl.BlockSpec((1, TB, out_rows, 128), out_idx),
            ],
        ),
        compiler_params=pltpu.CompilerParams(
            dimension_semantics=("parallel", "parallel", "arbitrary"),
            vmem_limit_bytes=32 << 20,             # safe on v5e/v6e/v7x
        ),
    )(hest3, h3)

    num = jnp.sum(num_w, axis=(0, 2, 3))   # (B,)
    den = jnp.sum(den_w, axis=(0, 2, 3))   # (B,)

    # NOTE: an all-zero H batch row yields inf/nan, matching PyTorch semantics.
    return jnp.mean(num / den)


def _nmse_ref(hest, h):
    B = h.shape[0]
    hf = h.reshape(B, -1).astype(jnp.float32)
    ef = hest.reshape(B, -1).astype(jnp.float32)
    num = jnp.sum((hf - ef) ** 2, axis=1)
    den = jnp.sum(hf ** 2, axis=1)
    return jnp.mean(num / den)


def _check(shape, key):
    k1, k2 = jax.random.split(key)
    Htrue = jax.random.normal(k1, shape, dtype=jnp.float32)
    Hest = Htrue + 0.1 * jax.random.normal(k2, shape, dtype=jnp.float32)
    loss = jax.block_until_ready(nmse_loss(Hest, Htrue))
    ref = jax.block_until_ready(_nmse_ref(Hest, Htrue))
    assert jnp.allclose(loss, ref, rtol=1e-4, atol=1e-6), (shape, loss, ref)


if __name__ == "__main__":
    key = jax.random.PRNGKey(0)
    keys = jax.random.split(key, 3)
    # NCHW inputs, as a channel-estimation tensor would be shaped.
    _check((2, 4, 16, 16), keys[0])        # aligned N, batch-blocked path
    _check((3, 3, 20, 20), keys[1])        # ragged N -> zero-pad path
    _check((1, 2, 364, 364), keys[2])      # chunked + masked + v7x-split path
    print("KERNEL_OK")
</pallas_src>

<mosaic_0001>
module attributes {stable_mosaic.version = 11 : i64} {
  func.func @kernel(%arg0: i32, %arg1: i32, %arg2: i32, %arg3: memref<2x8x128xf32, #tpu.memory_space<vmem>>, %arg4: memref<2x8x128xf32, #tpu.memory_space<vmem>>, %arg5: memref<1x2x1x128xf32, #tpu.memory_space<vmem>>, %arg6: memref<1x2x1x128xf32, #tpu.memory_space<vmem>>) attributes {dimension_semantics = [#tpu.dimension_semantics<parallel>, #tpu.dimension_semantics<parallel>, #tpu.dimension_semantics<arbitrary>], iteration_bounds = array<i64: 1, 1, 1>, scalar_prefetch = 0 : i64, scratch_operands = 0 : i64, tpu.core_type = #tpu.core_type<tc>, window_params = [{transform_indices = @transform_0, window_bounds = array<i64: 2, 8, 128>}, {transform_indices = @transform_1, window_bounds = array<i64: 2, 8, 128>}, {transform_indices = @transform_2, window_bounds = array<i64: 1, 2, 1, 128>}, {transform_indices = @transform_3, window_bounds = array<i64: 1, 2, 1, 128>}]} {
    %c0_i32 = arith.constant 0 : i32
    %c2_i32 = arith.constant 2 : i32
    %0 = arith.muli %c0_i32, %c2_i32 : i32
    %1 = tpu.assume_multiple %0, 2 : i32
    %cst = arith.constant 0.000000e+00 : f32
    %2 = vector.broadcast %cst : f32 to vector<2x8x128xf32>
    %c0_i32_0 = arith.constant 0 : i32
    %c8_i32 = arith.constant 8 : i32
    %3 = arith.muli %c0_i32_0, %c8_i32 : i32
    %4 = tpu.assume_multiple %3, 8 : i32
    %5 = arith.index_cast %1 : i32 to index
    %6 = arith.index_cast %4 : i32 to index
    %c0 = arith.constant 0 : index
    %7 = vector.load %arg4[%5, %6, %c0] : memref<2x8x128xf32, #tpu.memory_space<vmem>>, vector<2x8x128xf32>
    %8 = arith.index_cast %1 : i32 to index
    %9 = arith.index_cast %4 : i32 to index
    %c0_1 = arith.constant 0 : index
    %10 = vector.load %arg3[%8, %9, %c0_1] : memref<2x8x128xf32, #tpu.memory_space<vmem>>, vector<2x8x128xf32>
    %11 = arith.subf %7, %10 : vector<2x8x128xf32>
    %12 = arith.mulf %11, %11 : vector<2x8x128xf32>
    %13 = arith.mulf %7, %7 : vector<2x8x128xf32>
    %14 = vector.shape_cast %12 : vector<2x8x128xf32> to vector<2x1x8x128xf32>
    %cst_2 = arith.constant dense<0.000000e+00> : vector<2x8x128xf32>
    %15 = vector.multi_reduction <add>, %14, %cst_2 [1] : vector<2x1x8x128xf32> to vector<2x8x128xf32>
    %16 = arith.addf %2, %15 : vector<2x8x128xf32>
    %17 = vector.shape_cast %13 : vector<2x8x128xf32> to vector<2x1x8x128xf32>
    %cst_3 = arith.constant dense<0.000000e+00> : vector<2x8x128xf32>
    %18 = vector.multi_reduction <add>, %17, %cst_3 [1] : vector<2x1x8x128xf32> to vector<2x8x128xf32>
    %19 = arith.addf %2, %18 : vector<2x8x128xf32>
    %c1_i32 = arith.constant 1 : i32
    %cst_4 = arith.constant dense<0.000000e+00> : vector<2x128xf32>
    %20 = vector.multi_reduction <add>, %16, %cst_4 [1] : vector<2x8x128xf32> to vector<2x128xf32>
    %21 = vector.shape_cast %20 : vector<2x128xf32> to vector<2x1x128xf32>
    %c0_5 = arith.constant 0 : index
    %22 = arith.index_cast %1 : i32 to index
    %c0_6 = arith.constant 0 : index
    %c0_7 = arith.constant 0 : index
    %23 = vector.load %arg5[%c0_5, %22, %c0_6, %c0_7] : memref<1x2x1x128xf32, #tpu.memory_space<vmem>>, vector<1x2x1x128xf32>
    %24 = vector.shape_cast %23 : vector<1x2x1x128xf32> to vector<2x1x128xf32>
    %25 = vector.shape_cast %21 : vector<2x1x128xf32> to vector<1x2x1x128xf32>
    tpu.vector_store %arg5[%c0_5, %22, %c0_6, %c0_7], %25 {strides = array<i32>} : memref<1x2x1x128xf32, #tpu.memory_space<vmem>>, vector<1x2x1x128xf32>,
    %cst_8 = arith.constant dense<0.000000e+00> : vector<2x128xf32>
    %26 = vector.multi_reduction <add>, %19, %cst_8 [1] : vector<2x8x128xf32> to vector<2x128xf32>
    %27 = vector.shape_cast %26 : vector<2x128xf32> to vector<2x1x128xf32>
    %c0_9 = arith.constant 0 : index
    %28 = arith.index_cast %1 : i32 to index
    %c0_10 = arith.constant 0 : index
    %c0_11 = arith.constant 0 : index
    %29 = vector.load %arg6[%c0_9, %28, %c0_10, %c0_11] : memref<1x2x1x128xf32, #tpu.memory_space<vmem>>, vector<1x2x1x128xf32>
    %30 = vector.shape_cast %29 : vector<1x2x1x128xf32> to vector<2x1x128xf32>
    %31 = vector.shape_cast %27 : vector<2x1x128xf32> to vector<1x2x1x128xf32>
    tpu.vector_store %arg6[%c0_9, %28, %c0_10, %c0_11], %31 {strides = array<i32>} : memref<1x2x1x128xf32, #tpu.memory_space<vmem>>, vector<1x2x1x128xf32>,
    %c1_i32_12 = arith.constant 1 : i32
    return
  }
  func.func @transform_0(%arg0: i32, %arg1: i32, %arg2: i32) -> (i32, i32, i32) {
    %c0_i32 = arith.constant 0 : i32
    %c0_i32_0 = arith.constant 0 : i32
    return %arg1, %arg2, %c0_i32 : i32, i32, i32
  }
  func.func @transform_1(%arg0: i32, %arg1: i32, %arg2: i32) -> (i32, i32, i32) {
    %c0_i32 = arith.constant 0 : i32
    %c0_i32_0 = arith.constant 0 : i32
    return %arg1, %arg2, %c0_i32 : i32, i32, i32
  }
  func.func @transform_2(%arg0: i32, %arg1: i32, %arg2: i32) -> (i32, i32, i32, i32) {
    %c0_i32 = arith.constant 0 : i32
    %c0_i32_0 = arith.constant 0 : i32
    %c0_i32_1 = arith.constant 0 : i32
    return %arg0, %arg1, %c0_i32, %c0_i32_0 : i32, i32, i32, i32
  }
  func.func @transform_3(%arg0: i32, %arg1: i32, %arg2: i32) -> (i32, i32, i32, i32) {
    %c0_i32 = arith.constant 0 : i32
    %c0_i32_0 = arith.constant 0 : i32
    %c0_i32_1 = arith.constant 0 : i32
    return %arg0, %arg1, %c0_i32, %c0_i32_0 : i32, i32, i32, i32
  }
}

</mosaic_0001>

<bundles_post_ra>
// kernel: tpu_custom_call.1
= control target key start
LH: loop header
LB: loop body
LE: loop exit
PB: predicated region body
PF: predicated region fallthrough
CT: control target
= control target key end

     0   :  { %9 = vsyncpa [#allocation3], 0  ;;  %s314_s0 = inlined_call_operand.hbm [shape: f32[2,8,128], index: 0, kind: input, shape index: {}]   ;;  %s315_s1 = inlined_call_operand.hbm [shape: f32[2,8,128], index: 1, kind: input, shape index: {}]   ;;  %s316_s2 = inlined_call_operand.hbm [shape: f32[1,2,1,128], index: 2, kind: output, shape index: {0}]   ;;  %s317_s3 = inlined_call_operand.hbm [shape: f32[1,2,1,128], index: 3, kind: output, shape index: {1}]  }
   0x1   :  { %10 = vsyncpa [#allocation6], 0 }
   0x2   :  { %11 = vsyncpa [#allocation4], 0 }
   0x3   :  { %12 = vsyncpa [#allocation9], 0  ;;  %s231_s12 = smov [#allocation2]   ;;  %s135_s16 = scalar_lea.hbm %s314_s0, 256 }
   0x4   :  { %s18_s13 = sshll.u32 %s231_s12, 4  ;;  %p136_p0 = scmp.ne.s32.totalorder %s314_s0, %s135_s16  ;;  %s19_s13 = int_to_ptr.vmem [resolvable:$true] %s18_s13 }
   0x5   :  { %p139_p1 = scmp.lt.u32.totalorder %s135_s16, %s314_s0 }
   0x7   :  { %p141_p2 = pnand %p139_p1, %p136_p0 }
   0x9   :  { %144 = shalt.err (!%p141_p2)
}
   0xa   :  { %s145_s21 = scalar_lea.vmem %s19_s13, 256  ;;  %p150_p4 = scmp.lt.s32.totalorder %s19_s13, %s19_s13 }
   0xb   :  { %p146_p3 = scmp.ne.s32.totalorder %s19_s13, %s145_s21  ;;  %p151_p5 = scmp.lt.s32.totalorder %s145_s21, %s145_s21 }
   0xd   :  { %p152_p6 = por %p151_p5, %p150_p4 }
   0xf   :  { %p153_p7 = pnand %p152_p6, %p146_p3 }
  0x11   :  { %156 = shalt.err (!%p153_p7)
}
  0x12   :  { %s232_s22 = smov 128   ;;  %s233_s23 = smov 8  }
  0x13   :  { %24 = dma.hbm_to_vmem [thread:$0]  %s314_s0, 256, %s19_s13, [#allocation3], %s232_s22, %s232_s22, %s233_s23  }
  0x14   :  { %s234_s26 = smov [#allocation5]   ;;  %s157_s30 = scalar_lea.hbm %s315_s1, 256 }
  0x15   :  { %s30_s27 = sshll.u32 %s234_s26, 4  ;;  %p158_p8 = scmp.ne.s32.totalorder %s315_s1, %s157_s30  ;;  %s31_s27 = int_to_ptr.vmem [resolvable:$true] %s30_s27 }
  0x16   :  { %p161_p9 = scmp.lt.u32.totalorder %s157_s30, %s315_s1 }
  0x18   :  { %p163_p10 = pnand %p161_p9, %p158_p8 }
  0x1a   :  { %166 = shalt.err (!%p163_p10)
}
  0x1b   :  { %s167_s8 = scalar_lea.vmem %s31_s27, 256  ;;  %p172_p12 = scmp.lt.s32.totalorder %s31_s27, %s31_s27 }
  0x1c   :  { %p168_p11 = scmp.ne.s32.totalorder %s31_s27, %s167_s8  ;;  %p173_p13 = scmp.lt.s32.totalorder %s167_s8, %s167_s8 }
  0x1e   :  { %p174_p0 = por %p173_p13, %p172_p12 }
  0x20   :  { %p175_p1 = pnand %p174_p0, %p168_p11 }
  0x22   :  { %178 = shalt.err (!%p175_p1)
}
  0x23   :  { %36 = dma.hbm_to_vmem [thread:$0]  %s315_s1, 256, %s31_s27, [#allocation6], %s232_s22, %s232_s22, %s233_s23  }
  0x24   :  { %223 = dma.done.wait [#allocation3], 256  }
  0x25   :  { %224 = vsyncadd [#allocation3], 4294967040 }
  0x26   :  { %225 = dma.done.wait [#allocation6], 256  }
  0x27   :  { %226 = vsyncadd [#allocation6], 4294967040  ;;  %v46_v0 = vld [vmem:[#allocation5] sm:$0xff]  ;;  %v49_v1 = vld [vmem:[#allocation2] sm:$0xff]  ;;  %s235_s1 = smov [#allocation8]   ;;  %s236_s11 = smov [#allocation7]  }
  0x28   :  { %v47_v2 = vld [vmem:[#allocation5 + $0x8] sm:$0xff]  ;;  %v51_v3 = vsub.f32 %v46_v0, %v49_v1  ;;  %v50_v4 = vld [vmem:[#allocation2 + $0x8] sm:$0xff]  ;;  %v55_v5 = vmul.f32 %v46_v0, %v46_v0  ;;  %s110_s10 = sshll.u32 %s235_s1, 4  ;;  %s98_s12 = sshll.u32 %s236_s11, 4  ;;  %s111_s10 = int_to_ptr.vmem [resolvable:$true] %s110_s10  ;;  %s283_s12 = int_to_ptr.vmem [resolvable:$true] %s98_s12 }
  0x29   :  { %v56_v6 = vmul.f32 %v47_v2, %v47_v2  ;;  %v52_v7 = vsub.f32 %v47_v2, %v50_v4  ;;  %s179_s13 = scalar_lea.vmem %s111_s10, 32  ;;  %p184_p3 = scmp.lt.s32.totalorder %s111_s10, %s111_s10 }
  0x2a   :  { %v53_v8 = vmul.f32 %v51_v3, %v51_v3  ;;  %v79_v9 = vrot.slane %v55_v5, 4  ;;  %p180_p2 = scmp.ne.s32.totalorder %s111_s10, %s179_s13  ;;  %p185_p4 = scmp.lt.s32.totalorder %s179_s13, %s179_s13 }
  0x2b   :  { %v85_v10 = vrot.slane %v56_v6, 4  ;;  %v54_v11 = vmul.f32 %v52_v7, %v52_v7 }
  0x2c   :  { %v65_v12 = vrot.slane %v53_v8, 4  ;;  %v80_v13 = vadd.f32 %v79_v9, %v55_v5  ;;  %p186_p5 = por %p185_p4, %p184_p3 }
  0x2d   :  { %v86_v14 = vadd.f32 %v85_v10, %v56_v6  ;;  %v71_v15 = vrot.slane %v54_v11, 4 }
  0x2e   :  { %v66_v16 = vadd.f32 %v65_v12, %v53_v8  ;;  %v81_v17 = vrot.slane %v80_v13, 2  ;;  %p187_p6 = pnand %p186_p5, %p180_p2 }
  0x2f   :  { %v87_v18 = vrot.slane %v86_v14, 2  ;;  %v72_v19 = vadd.f32 %v71_v15, %v54_v11 }
  0x30   :  { %v67_v20 = vrot.slane %v66_v16, 2  ;;  %v82_v21 = vadd.f32 %v81_v17, %v80_v13 }
  0x31   :  { %v88_v22 = vadd.f32 %v87_v18, %v86_v14  ;;  %v73_v23 = vrot.slane %v72_v19, 2 }
  0x32   :  { %v68_v24 = vadd.f32 %v67_v20, %v66_v16  ;;  %v83_v25 = vrot.slane %v82_v21, 1 }
  0x33   :  { %v89_v26 = vrot.slane %v88_v22, 1  ;;  %v74_v27 = vadd.f32 %v73_v23, %v72_v19 }
  0x34   :  { %v69_v28 = vrot.slane %v68_v24, 1  ;;  %v84_v29 = vadd.f32 %v83_v25, %v82_v21 }
  0x35   :  { %v90_v30 = vadd.f32 %v89_v26, %v88_v22  ;;  %v75_v31 = vrot.slane %v74_v27, 1 }
  0x36   :  { %v70_v32 = vadd.f32 %v69_v28, %v68_v24  ;;  %91 = vst [vmem:[#allocation8] sm:$0x1] %v84_v29 }
  0x37   :  { %92 = vst [vmem:[#allocation8 + $0x1] sm:$0x1] %v90_v30  ;;  %v76_v33 = vadd.f32 %v75_v31, %v74_v27 }
  0x38   :  { %190 = shalt.err (!%p187_p6)
}
  0x39   :  { %s191_s16 = scalar_lea.hbm %s317_s3, 32 }
  0x3a   :  { %p192_p7 = scmp.ne.s32.totalorder %s317_s3, %s191_s16  ;;  %p195_p8 = scmp.lt.u32.totalorder %s191_s16, %s317_s3 }
  0x3c   :  { %p197_p9 = pnand %p195_p8, %p192_p7 }
  0x3e   :  { %200 = shalt.err (!%p197_p9)
}
  0x3f   :  { %s237_s21 = smov 16   ;;  %s238_s22 = smov 1   ;;  %77 = vst [vmem:[#allocation7] sm:$0x1] %v70_v32  ;;  %78 = vst [vmem:[#allocation7 + $0x1] sm:$0x1] %v76_v33 }
  0x40   :  { %116 = dma.vmem_to_hbm [thread:$0]  %s111_s10, 32, %s317_s3, [#allocation9], %s237_s21, %s237_s21, %s238_s22  }
  0x41   :  { %s201_s25 = scalar_lea.vmem %s283_s12, 32  ;;  %p206_p11 = scmp.lt.s32.totalorder %s283_s12, %s283_s12 }
  0x42   :  { %p202_p10 = scmp.ne.s32.totalorder %s283_s12, %s201_s25  ;;  %p207_p12 = scmp.lt.s32.totalorder %s201_s25, %s201_s25 }
  0x44   :  { %p208_p13 = por %p207_p12, %p206_p11 }
  0x46   :  { %p209_p0 = pnand %p208_p13, %p202_p10 }
  0x48   :  { %212 = shalt.err (!%p209_p0)
}
  0x49   :  { %s213_s28 = scalar_lea.hbm %s316_s2, 32 }
  0x4a   :  { %p214_p1 = scmp.ne.s32.totalorder %s316_s2, %s213_s28  ;;  %p217_p2 = scmp.lt.u32.totalorder %s213_s28, %s316_s2 }
  0x4c   :  { %p219_p3 = pnand %p217_p2, %p214_p1 }
  0x4e   :  { %222 = shalt.err (!%p219_p3)
}
  0x4f   :  { %104 = dma.vmem_to_hbm [thread:$0]  %s283_s12, 32, %s316_s2, [#allocation4], %s237_s21, %s237_s21, %s238_s22  }
  0x50   :  { %227 = dma.done.wait [#allocation4], 32  }
  0x51   :  { %228 = vsyncadd [#allocation4], 4294967264 }
  0x52   :  { %229 = dma.done.wait [#allocation9], 32  }
  0x53   :  { %230 = vsyncadd [#allocation9], 4294967264 }
  0x54   :  { %123 = vsyncpa [#allocation3], 1 }
  0x55   :  { %124 = vsyncpa [#allocation6], 1 }
  0x56   :  { %125 = vsyncpa [#allocation4], 1 }
  0x57   :  { %126 = vsyncpa [#allocation9], 1 }

</bundles_post_ra>
